<compile_context>
chip_gen: v7x
topology: tpu7x:2x2x1
jax: 0.10.0
libtpu: 0.0.40
codegen_flags: <defaults>
</compile_context>

<pallas_src>
import functools

import jax
import jax.numpy as jnp
from jax.experimental import pallas as pl
from jax.experimental.pallas import tpu as pltpu


def _round_up(x, m):
    return (x + m - 1) // m * m


def _supports_bf16_vpu():
    """True on chips with bf16 VPU/EUP (v6e / v7x); False on v5e and older."""
    try:
        kind = jax.devices()[0].device_kind.lower()
    except Exception:
        return False
    for old in ("v2", "v3", "v4", "v5"):
        if old in kind:
            return False
    return ("v6" in kind) or ("v7" in kind)


# ---------------------------------------------------------------------------
# Kernel
# ---------------------------------------------------------------------------
def link_predictor_kernel(zs_ref, zd_ref,              # (tm, C) f32, (tm, C) f32
                          w1a_ref, w1b_ref, b1_ref,    # (C,8C) bf16 x2, (1,8C) f32
                          w2_ref, b2_ref,              # (8C,2C) bf16, (1,2C) f32
                          w3_ref, b3_ref,              # (2C,C/2) bf16, (1,C/2) f32
                          w4_ref, b4_ref,              # (C/2,O) bf16, (1,O) f32
                          out_ref,                     # (tm, O) f32
                          *, bf16_epilogue):
    f32 = jnp.float32
    bf16 = jnp.bfloat16

    zs = zs_ref[...].astype(bf16)
    zd = zd_ref[...].astype(bf16)

    # Fused [lin_src | lin_dst] + lin1 as two accumulating dots (exact folding,
    # see prepare_params).
    h = jnp.dot(zs, w1a_ref[...], preferred_element_type=f32)
    h = h + jnp.dot(zd, w1b_ref[...], preferred_element_type=f32)
    h = h + b1_ref[...]

    if bf16_epilogue:
        # v6e/v7x: bf16 VPU/EUP -> do bias+tanh epilogue in bf16, no extra cast.
        h = jnp.tanh(h.astype(bf16))                    # Dropout -> identity, Tanh
        h = jnp.dot(h, w2_ref[...], preferred_element_type=f32) + b2_ref[...]
        h = jnp.tanh(h.astype(bf16))
        h = jnp.dot(h, w3_ref[...], preferred_element_type=f32) + b3_ref[...]
        h = jnp.tanh(h.astype(bf16))
    else:
        # v5e and older: f32 tanh (no bf16 VPU/EUP), cast only for the MXU dot.
        h = jnp.tanh(h)
        h = jnp.tanh(jnp.dot(h.astype(bf16), w2_ref[...],
                             preferred_element_type=f32) + b2_ref[...])
        h = jnp.tanh(jnp.dot(h.astype(bf16), w3_ref[...],
                             preferred_element_type=f32) + b3_ref[...])
        h = h.astype(bf16)

    out = jnp.dot(h, w4_ref[...], preferred_element_type=f32) + b4_ref[...]
    out_ref[...] = out.astype(out_ref.dtype)            # narrow (N, O) writeback


# ---------------------------------------------------------------------------
# Wrapper
# ---------------------------------------------------------------------------
def _choose_tile_m(n, tile_m):
    if tile_m is None:
        tile_m = 1024                      # amortize per-grid-step overhead
    tile_m = int(tile_m)
    if n > 8:
        # Ensure >= 2 grid steps so v7x megacore (2 TCs) gets both cores busy.
        tile_m = min(tile_m, _round_up(pl.cdiv(n, 2), 8))
    tile_m = min(tile_m, _round_up(n, 8))
    tile_m = max(8, (tile_m // 8) * 8)     # f32 (8,128) sublane divisibility
    return tile_m


def link_predictor(z_src, z_dst, kp, out_channels, tile_m=None):
    """kp: prepared kernel params from prepare_params()."""
    n, c = z_src.shape
    assert z_dst.shape == (n, c)
    out_ch = int(out_channels)

    tile_m = _choose_tile_m(n, tile_m)
    grid = (pl.cdiv(n, tile_m),)

    weights = (kp["w1a"], kp["w1b"], kp["b1"],
               kp["w2"], kp["b2"],
               kp["w3"], kp["b3"],
               kp["w4"], kp["b4"])

    z_spec = pl.BlockSpec((tile_m, c), lambda i: (i, 0))
    weight_specs = [pl.BlockSpec(w.shape, lambda i: (0, 0)) for w in weights]

    bf16_epi = _supports_bf16_vpu()
    kernel = functools.partial(link_predictor_kernel, bf16_epilogue=bf16_epi)

    flops = 2 * n * (2 * c * 8 * c            # layer 1 (two C-wide dots)
                     + 8 * c * 2 * c          # layer 2
                     + 2 * c * (c // 2)       # layer 3
                     + (c // 2) * out_ch)     # layer 4
    transcendentals = n * (8 * c + 2 * c + c // 2)
    bytes_accessed = (2 * n * c * 4                      # z_src + z_dst reads (f32)
                      + n * out_ch * 4                   # narrow f32 output write
                      + sum(int(w.size) * w.dtype.itemsize for w in weights))

    out = pl.pallas_call(
        kernel,
        out_shape=jax.ShapeDtypeStruct((n, out_ch), jnp.float32),
        grid=grid,
        in_specs=[z_spec, z_spec] + weight_specs,
        out_specs=pl.BlockSpec((tile_m, out_ch), lambda i: (i, 0)),
        compiler_params=pltpu.CompilerParams(
            dimension_semantics=("parallel",),           # megacore on v7x
            vmem_limit_bytes=32 * 1024 * 1024),
        cost_estimate=pl.CostEstimate(
            flops=flops,
            transcendentals=transcendentals,
            bytes_accessed=bytes_accessed),
    )(z_src, z_dst, *weights)

    return out


# ---------------------------------------------------------------------------
# Parameter construction
# ---------------------------------------------------------------------------
def init_params(key, in_channels, out_channels):
    """Raw params, PyTorch-style U(-1/sqrt(fan_in), 1/sqrt(fan_in)); weights
    stored pre-transposed as (in_features, out_features), biases as (1, out)."""
    c = in_channels

    def linear(key, fan_in, fan_out):
        kw, kb = jax.random.split(key)
        bound = 1.0 / jnp.sqrt(fan_in)
        w = jax.random.uniform(kw, (fan_in, fan_out), jnp.float32, -bound, bound)
        b = jax.random.uniform(kb, (1, fan_out), jnp.float32, -bound, bound)
        return w, b

    keys = jax.random.split(key, 6)
    wsrc, bsrc = linear(keys[0], c, 2 * c)
    wdst, bdst = linear(keys[1], c, 2 * c)
    w1, b1 = linear(keys[2], 4 * c, 8 * c)
    w2, b2 = linear(keys[3], 8 * c, 2 * c)
    w3, b3 = linear(keys[4], 2 * c, c // 2)
    w4, b4 = linear(keys[5], c // 2, out_channels)
    return dict(wsrc=wsrc, bsrc=bsrc, wdst=wdst, bdst=bdst,
                w1=w1, b1=b1, w2=w2, b2=b2, w3=w3, b3=b3, w4=w4, b4=b4)


def prepare_params(raw, out_channels):
    """One-time offline precompute: fold lin_src/lin_dst into lin1 (exact —
    no nonlinearity between them), cast MXU operands to bf16, biases stay f32.
    No output padding: the kernel emits a narrow (N, out_channels) result."""
    bf16 = jnp.bfloat16
    c = raw["wsrc"].shape[0]
    w1a = raw["w1"][: 2 * c, :]              # rows applied to lin_src output
    w1b = raw["w1"][2 * c:, :]               # rows applied to lin_dst output

    w1a_f = raw["wsrc"] @ w1a                # (C, 8C)
    w1b_f = raw["wdst"] @ w1b                # (C, 8C)
    b1f = raw["b1"] + raw["bsrc"] @ w1a + raw["bdst"] @ w1b   # (1, 8C)

    del out_channels  # kept for interface parity; no padding needed anymore
    return {
        "w1a": w1a_f.astype(bf16), "w1b": w1b_f.astype(bf16), "b1": b1f,
        "w2": raw["w2"].astype(bf16), "b2": raw["b2"],
        "w3": raw["w3"].astype(bf16), "b3": raw["b3"],
        "w4": raw["w4"].astype(bf16), "b4": raw["b4"],
    }


# ---------------------------------------------------------------------------
# References
# ---------------------------------------------------------------------------
def _reference_f32(z_src, z_dst, p):
    """Pure-JAX f32 replica of the PyTorch forward (eval mode)."""
    h = jnp.concatenate([z_src @ p["wsrc"] + p["bsrc"],
                         z_dst @ p["wdst"] + p["bdst"]], axis=-1)
    h = jnp.tanh(h @ p["w1"] + p["b1"])
    h = jnp.tanh(h @ p["w2"] + p["b2"])
    h = jnp.tanh(h @ p["w3"] + p["b3"])
    return h @ p["w4"] + p["b4"]


def _emulate_kernel(z_src, z_dst, kp, bf16_epilogue):
    """Pure-JAX replica of the exact kernel math (bf16 MXU operands, f32 acc)."""
    bf16, f32 = jnp.bfloat16, jnp.float32
    zs = z_src.astype(bf16)
    zd = z_dst.astype(bf16)
    h = (jnp.dot(zs, kp["w1a"], preferred_element_type=f32)
         + jnp.dot(zd, kp["w1b"], preferred_element_type=f32) + kp["b1"])
    if bf16_epilogue:
        h = jnp.tanh(h.astype(bf16))
        h = jnp.dot(h, kp["w2"], preferred_element_type=f32) + kp["b2"]
        h = jnp.tanh(h.astype(bf16))
        h = jnp.dot(h, kp["w3"], preferred_element_type=f32) + kp["b3"]
        h = jnp.tanh(h.astype(bf16))
    else:
        h = jnp.tanh(h)
        h = jnp.tanh(jnp.dot(h.astype(bf16), kp["w2"],
                             preferred_element_type=f32) + kp["b2"])
        h = jnp.tanh(jnp.dot(h.astype(bf16), kp["w3"],
                             preferred_element_type=f32) + kp["b3"])
        h = h.astype(bf16)
    return jnp.dot(h.astype(bf16), kp["w4"], preferred_element_type=f32) + kp["b4"]


# ---------------------------------------------------------------------------
if __name__ == "__main__":
    in_channels = 32
    out_channels = 8
    batch = 48

    key = jax.random.PRNGKey(0)
    k_src, k_dst, k_par = jax.random.split(key, 3)

    z_src = jax.random.normal(k_src, (batch, in_channels), jnp.float32)
    z_dst = jax.random.normal(k_dst, (batch, in_channels), jnp.float32)

    raw = init_params(k_par, in_channels, out_channels)
    kp = prepare_params(raw, out_channels)

    # Small tile so the test exercises the batch grid / pipelining
    # (production default tile_m=1024, auto-capped so grid >= 2).
    out = link_predictor(z_src, z_dst, kp, out_channels, tile_m=16)
    out = jax.block_until_ready(out)
    assert out.shape == (batch, out_channels), out.shape

    # Structural correctness: identical math (bf16 MXU operands, f32 accum,
    # same epilogue dtype as the kernel chose for this chip).
    ref_same = _emulate_kernel(z_src, z_dst, kp, _supports_bf16_vpu())
    assert jnp.allclose(out, ref_same, atol=1e-2, rtol=1e-2), (
        "mismatch vs same-math reference: "
        f"{float(jnp.max(jnp.abs(out - ref_same)))}")

    # Semantic fidelity vs the full-f32 PyTorch-equivalent forward.
    ref_f32 = _reference_f32(z_src, z_dst, raw)
    assert jnp.allclose(out, ref_f32, atol=1e-1, rtol=1e-1), (
        "mismatch vs f32 reference: "
        f"{float(jnp.max(jnp.abs(out - ref_f32)))}")

    print("KERNEL_OK")
</pallas_src>

<mosaic_0001>
module attributes {stable_mosaic.version = 11 : i64} {
  func.func @link_predictor_kernel(%arg0: i32, %arg1: memref<16x32xf32, #tpu.memory_space<vmem>>, %arg2: memref<16x32xf32, #tpu.memory_space<vmem>>, %arg3: memref<32x256xbf16, #tpu.memory_space<vmem>>, %arg4: memref<32x256xbf16, #tpu.memory_space<vmem>>, %arg5: memref<1x256xf32, #tpu.memory_space<vmem>>, %arg6: memref<256x64xbf16, #tpu.memory_space<vmem>>, %arg7: memref<1x64xf32, #tpu.memory_space<vmem>>, %arg8: memref<64x16xbf16, #tpu.memory_space<vmem>>, %arg9: memref<1x16xf32, #tpu.memory_space<vmem>>, %arg10: memref<16x8xbf16, #tpu.memory_space<vmem>>, %arg11: memref<1x8xf32, #tpu.memory_space<vmem>>, %arg12: memref<16x8xf32, #tpu.memory_space<vmem>>) attributes {dimension_semantics = [#tpu.dimension_semantics<parallel>], iteration_bounds = array<i64: 3>, scalar_prefetch = 0 : i64, scratch_operands = 0 : i64, tpu.core_type = #tpu.core_type<tc>, window_params = [{transform_indices = @transform_0, window_bounds = array<i64: 16, 32>}, {transform_indices = @transform_1, window_bounds = array<i64: 16, 32>}, {pipeline_mode = #tpu.pipeline_mode<synchronous>, transform_indices = @transform_2, window_bounds = array<i64: 32, 256>}, {pipeline_mode = #tpu.pipeline_mode<synchronous>, transform_indices = @transform_3, window_bounds = array<i64: 32, 256>}, {pipeline_mode = #tpu.pipeline_mode<synchronous>, transform_indices = @transform_4, window_bounds = array<i64: 1, 256>}, {pipeline_mode = #tpu.pipeline_mode<synchronous>, transform_indices = @transform_5, window_bounds = array<i64: 256, 64>}, {pipeline_mode = #tpu.pipeline_mode<synchronous>, transform_indices = @transform_6, window_bounds = array<i64: 1, 64>}, {pipeline_mode = #tpu.pipeline_mode<synchronous>, transform_indices = @transform_7, window_bounds = array<i64: 64, 16>}, {pipeline_mode = #tpu.pipeline_mode<synchronous>, transform_indices = @transform_8, window_bounds = array<i64: 1, 16>}, {pipeline_mode = #tpu.pipeline_mode<synchronous>, transform_indices = @transform_9, window_bounds = array<i64: 16, 8>}, {pipeline_mode = #tpu.pipeline_mode<synchronous>, transform_indices = @transform_10, window_bounds = array<i64: 1, 8>}, {transform_indices = @transform_11, window_bounds = array<i64: 16, 8>}]} {
    %c0 = arith.constant 0 : index
    %c0_0 = arith.constant 0 : index
    %0 = vector.load %arg1[%c0, %c0_0] : memref<16x32xf32, #tpu.memory_space<vmem>>, vector<16x32xf32>
    %1 = arith.truncf %0 : vector<16x32xf32> to vector<16x32xbf16>
    %c0_1 = arith.constant 0 : index
    %c0_2 = arith.constant 0 : index
    %2 = vector.load %arg2[%c0_1, %c0_2] : memref<16x32xf32, #tpu.memory_space<vmem>>, vector<16x32xf32>
    %3 = arith.truncf %2 : vector<16x32xf32> to vector<16x32xbf16>
    %c0_3 = arith.constant 0 : index
    %c0_4 = arith.constant 0 : index
    %4 = vector.load %arg3[%c0_3, %c0_4] : memref<32x256xbf16, #tpu.memory_space<vmem>>, vector<32x256xbf16>
    %cst = arith.constant dense<0.000000e+00> : vector<16x256xf32>
    %5 = tpu.matmul %1, %4, %cst {dimension_numbers = #tpu.dot_dimension_numbers<[1], [0], [0], [1], [0, 0, 1, 1], [], []>} : vector<16x32xbf16>, vector<32x256xbf16>, vector<16x256xf32> -> vector<16x256xf32>
    %c0_5 = arith.constant 0 : index
    %c0_6 = arith.constant 0 : index
    %6 = vector.load %arg4[%c0_5, %c0_6] : memref<32x256xbf16, #tpu.memory_space<vmem>>, vector<32x256xbf16>
    %cst_7 = arith.constant dense<0.000000e+00> : vector<16x256xf32>
    %7 = tpu.matmul %3, %6, %cst_7 {dimension_numbers = #tpu.dot_dimension_numbers<[1], [0], [0], [1], [0, 0, 1, 1], [], []>} : vector<16x32xbf16>, vector<32x256xbf16>, vector<16x256xf32> -> vector<16x256xf32>
    %8 = arith.addf %5, %7 : vector<16x256xf32>
    %c0_8 = arith.constant 0 : index
    %c0_9 = arith.constant 0 : index
    %9 = vector.load %arg5[%c0_8, %c0_9] : memref<1x256xf32, #tpu.memory_space<vmem>>, vector<1x256xf32>
    %10 = vector.broadcast %9 : vector<1x256xf32> to vector<16x256xf32>
    %11 = arith.addf %8, %10 : vector<16x256xf32>
    %12 = math.tanh %11 : vector<16x256xf32>
    %13 = arith.truncf %12 : vector<16x256xf32> to vector<16x256xbf16>
    %c0_10 = arith.constant 0 : index
    %c0_11 = arith.constant 0 : index
    %14 = vector.load %arg6[%c0_10, %c0_11] : memref<256x64xbf16, #tpu.memory_space<vmem>>, vector<256x64xbf16>
    %cst_12 = arith.constant dense<0.000000e+00> : vector<16x64xf32>
    %15 = tpu.matmul %13, %14, %cst_12 {dimension_numbers = #tpu.dot_dimension_numbers<[1], [0], [0], [1], [0, 0, 1, 1], [], []>} : vector<16x256xbf16>, vector<256x64xbf16>, vector<16x64xf32> -> vector<16x64xf32>
    %c0_13 = arith.constant 0 : index
    %c0_14 = arith.constant 0 : index
    %16 = vector.load %arg7[%c0_13, %c0_14] : memref<1x64xf32, #tpu.memory_space<vmem>>, vector<1x64xf32>
    %17 = vector.broadcast %16 : vector<1x64xf32> to vector<16x64xf32>
    %18 = arith.addf %15, %17 : vector<16x64xf32>
    %19 = math.tanh %18 : vector<16x64xf32>
    %20 = arith.truncf %19 : vector<16x64xf32> to vector<16x64xbf16>
    %c0_15 = arith.constant 0 : index
    %c0_16 = arith.constant 0 : index
    %21 = vector.load %arg8[%c0_15, %c0_16] : memref<64x16xbf16, #tpu.memory_space<vmem>>, vector<64x16xbf16>
    %cst_17 = arith.constant dense<0.000000e+00> : vector<16x16xf32>
    %22 = tpu.matmul %20, %21, %cst_17 {dimension_numbers = #tpu.dot_dimension_numbers<[1], [0], [0], [1], [0, 0, 1, 1], [], []>} : vector<16x64xbf16>, vector<64x16xbf16>, vector<16x16xf32> -> vector<16x16xf32>
    %c0_18 = arith.constant 0 : index
    %c0_19 = arith.constant 0 : index
    %23 = vector.load %arg9[%c0_18, %c0_19] : memref<1x16xf32, #tpu.memory_space<vmem>>, vector<1x16xf32>
    %24 = vector.broadcast %23 : vector<1x16xf32> to vector<16x16xf32>
    %25 = arith.addf %22, %24 : vector<16x16xf32>
    %26 = math.tanh %25 : vector<16x16xf32>
    %27 = arith.truncf %26 : vector<16x16xf32> to vector<16x16xbf16>
    %c0_20 = arith.constant 0 : index
    %c0_21 = arith.constant 0 : index
    %28 = vector.load %arg10[%c0_20, %c0_21] : memref<16x8xbf16, #tpu.memory_space<vmem>>, vector<16x8xbf16>
    %cst_22 = arith.constant dense<0.000000e+00> : vector<16x8xf32>
    %29 = tpu.matmul %27, %28, %cst_22 {dimension_numbers = #tpu.dot_dimension_numbers<[1], [0], [0], [1], [0, 0, 1, 1], [], []>} : vector<16x16xbf16>, vector<16x8xbf16>, vector<16x8xf32> -> vector<16x8xf32>
    %c0_23 = arith.constant 0 : index
    %c0_24 = arith.constant 0 : index
    %30 = vector.load %arg11[%c0_23, %c0_24] : memref<1x8xf32, #tpu.memory_space<vmem>>, vector<1x8xf32>
    %31 = vector.broadcast %30 : vector<1x8xf32> to vector<16x8xf32>
    %32 = arith.addf %29, %31 : vector<16x8xf32>
    %c0_25 = arith.constant 0 : index
    %c0_26 = arith.constant 0 : index
    %33 = vector.load %arg12[%c0_25, %c0_26] : memref<16x8xf32, #tpu.memory_space<vmem>>, vector<16x8xf32>
    tpu.vector_store %arg12[%c0_25, %c0_26], %32 {strides = array<i32>} : memref<16x8xf32, #tpu.memory_space<vmem>>, vector<16x8xf32>,
    return
  }
  func.func @transform_0(%arg0: i32) -> (i32, i32) {
    %c0_i32 = arith.constant 0 : i32
    %c0_i32_0 = arith.constant 0 : i32
    return %arg0, %c0_i32 : i32, i32
  }
  func.func @transform_1(%arg0: i32) -> (i32, i32) {
    %c0_i32 = arith.constant 0 : i32
    %c0_i32_0 = arith.constant 0 : i32
    return %arg0, %c0_i32 : i32, i32
  }
  func.func @transform_2(%arg0: i32) -> (i32, i32) {
    %c0_i32 = arith.constant 0 : i32
    %c0_i32_0 = arith.constant 0 : i32
    %c0_i32_1 = arith.constant 0 : i32
    return %c0_i32, %c0_i32_0 : i32, i32
  }
  func.func @transform_3(%arg0: i32) -> (i32, i32) {
    %c0_i32 = arith.constant 0 : i32
    %c0_i32_0 = arith.constant 0 : i32
    %c0_i32_1 = arith.constant 0 : i32
    return %c0_i32, %c0_i32_0 : i32, i32
  }
  func.func @transform_4(%arg0: i32) -> (i32, i32) {
    %c0_i32 = arith.constant 0 : i32
    %c0_i32_0 = arith.constant 0 : i32
    %c0_i32_1 = arith.constant 0 : i32
    return %c0_i32, %c0_i32_0 : i32, i32
  }
  func.func @transform_5(%arg0: i32) -> (i32, i32) {
    %c0_i32 = arith.constant 0 : i32
    %c0_i32_0 = arith.constant 0 : i32
    %c0_i32_1 = arith.constant 0 : i32
    return %c0_i32, %c0_i32_0 : i32, i32
  }
  func.func @transform_6(%arg0: i32) -> (i32, i32) {
    %c0_i32 = arith.constant 0 : i32
    %c0_i32_0 = arith.constant 0 : i32
    %c0_i32_1 = arith.constant 0 : i32
    return %c0_i32, %c0_i32_0 : i32, i32
  }
  func.func @transform_7(%arg0: i32) -> (i32, i32) {
    %c0_i32 = arith.constant 0 : i32
    %c0_i32_0 = arith.constant 0 : i32
    %c0_i32_1 = arith.constant 0 : i32
    return %c0_i32, %c0_i32_0 : i32, i32
  }
  func.func @transform_8(%arg0: i32) -> (i32, i32) {
    %c0_i32 = arith.constant 0 : i32
    %c0_i32_0 = arith.constant 0 : i32
    %c0_i32_1 = arith.constant 0 : i32
    return %c0_i32, %c0_i32_0 : i32, i32
  }
  func.func @transform_9(%arg0: i32) -> (i32, i32) {
    %c0_i32 = arith.constant 0 : i32
    %c0_i32_0 = arith.constant 0 : i32
    %c0_i32_1 = arith.constant 0 : i32
    return %c0_i32, %c0_i32_0 : i32, i32
  }
  func.func @transform_10(%arg0: i32) -> (i32, i32) {
    %c0_i32 = arith.constant 0 : i32
    %c0_i32_0 = arith.constant 0 : i32
    %c0_i32_1 = arith.constant 0 : i32
    return %c0_i32, %c0_i32_0 : i32, i32
  }
  func.func @transform_11(%arg0: i32) -> (i32, i32) {
    %c0_i32 = arith.constant 0 : i32
    %c0_i32_0 = arith.constant 0 : i32
    return %arg0, %c0_i32 : i32, i32
  }
}

</mosaic_0001>

<bundles_post_ra>
// kernel: tpu_custom_call.1
= control target key start
LH: loop header
LB: loop body
LE: loop exit
PB: predicated region body
PF: predicated region fallthrough
CT: control target
= control target key end

     0   :  { %s1210_s17 = smov 0   ;;  %s1338_s0 = inlined_call_operand.vmem [shape: f32[48,32], index: 0, kind: input, shape index: {}]   ;;  %s1339_s1 = inlined_call_operand.vmem [shape: f32[48,32], index: 1, kind: input, shape index: {}]   ;;  %s1340_s2 = inlined_call_operand.vmem [shape: bf16[32,256], index: 2, kind: input, shape index: {}]   ;;  %s1341_s3 = inlined_call_operand.vmem [shape: bf16[32,256], index: 3, kind: input, shape index: {}]   ;;  %s1342_s4 = inlined_call_operand.vmem [shape: f32[1,256], index: 4, kind: input, shape index: {}]   ;;  %s1343_s5 = inlined_call_operand.vmem [shape: bf16[256,64], index: 5, kind: input, shape index: {}]   ;;  %s1344_s6 = inlined_call_operand.vmem [shape: f32[1,64], index: 6, kind: input, shape index: {}]   ;;  %s1345_s7 = inlined_call_operand.vmem [shape: bf16[64,16], index: 7, kind: input, shape index: {}]   ;;  %s1346_s8 = inlined_call_operand.vmem [shape: f32[1,16], index: 8, kind: input, shape index: {}]   ;;  %s1347_s9 = inlined_call_operand.vmem [shape: bf16[16,8], index: 9, kind: input, shape index: {}]   ;;  %s1348_s10 = inlined_call_operand.vmem [shape: f32[1,8], index: 10, kind: input, shape index: {}]   ;;  %s1349_s11 = inlined_call_operand.vmem [shape: f32[48,8], index: 11, kind: output, shape index: {}]  }
   0x1 LB: > { %s979_s18 = sadd.s32 4294967295, %s1145_s17   ;;  %p983_p0 = scmp.ge.s32.totalorder %s1145_s17, 1  ;;  %s1145_s17 = sphi %s1210_s17, %s21_s17  }
   0x2   : > { %p349_p1 = scmp.lt.s32.totalorder %s1145_s17, 4 }
   0x4   : > { %p350_p2 = pnand %p983_p0, %p349_p1 }
   0x5   : > { %v1090_v0 = vld [vmem:[%s1341_s3 + $0x4] ss:$8 sps:$4 sm:$0xff] (!%p350_p2)   ;;  %s984_s21 = sshll.u32 (!%p350_p2), %s979_s18, 1  ;;  %v1092_v1 = vld [vmem:[%s1341_s3] ss:$8 sps:$4 sm:$0xff] (!%p350_p2)   ;;  %v1147_v2 = vmov (!%p350_p2), 0   ;;  %v562_v31 = vlaneseq (!%p350_p2) }
   0x6   : > { %353 = sbr.rel (%p350_p2) target bundleno = 940 (0x3ac), region = 64  ;;  %483 = vmatprep.mubr.bf16.mxu0 (!%p350_p2), %v1147_v2  ;;  %p395_p3 = scmp.lt.s32.totalorder (!%p350_p2), %s984_s21, 5  ;;  %451 = vmatprep.subr.bf16.mxu0 (!%p350_p2), %v1090_v0  ;;  %v1093_v3 = vld [vmem:[%s1341_s3 + $0x14] ss:$8 sps:$4 sm:$0xff] (!%p350_p2)   ;;  %v1095_v4 = vld [vmem:[%s1341_s3 + $0x10] ss:$8 sps:$4 sm:$0xff] (!%p350_p2)  }
   0x7   : > { %452 = vmatpush1.bf16.msra.mxu0 (!%p350_p2), %v1092_v1  ;;  %v1098_v5 = vld [vmem:[%s1340_s2 + $0x4] ss:$8 sps:$4 sm:$0xff] (!%p350_p2)   ;;  %vm447_vm0 = vcmask (!%p350_p2), 261120   ;;  %v1096_v9 = vld [vmem:[%s1340_s2] ss:$8 sps:$4 sm:$0xff] (!%p350_p2)   ;;  %v1106_v16 = vld [vmem:[%s1343_s5 + $0x50] sm:$0xff] (!%p350_p2)  }
   0x8   : > { %453 = vmatprep.subr.bf16.mxu0 (!%p350_p2), %v1093_v3  ;;  %v1102_v6 = vld [vmem:[%s1343_s5 + $0x40] sm:$0xff] (!%p350_p2)   ;;  %v1101_v11 = vld [vmem:[%s1340_s2 + $0x14] ss:$8 sps:$4 sm:$0xff] (!%p350_p2)   ;;  %v1099_v13 = vld [vmem:[%s1340_s2 + $0x10] ss:$8 sps:$4 sm:$0xff] (!%p350_p2)   ;;  %v563_v32 = vshrl.u32 (!%p350_p2), %v562_v31, 7 }
   0x9   : > { %1028 = vmatprep.subr.bf16.mxu1 (!%p350_p2), %v1102_v6  ;;  %v1103_v12 = vld [vmem:[%s1343_s5] sm:$0xff] (!%p350_p2)   ;;  %v1104_v14 = vld [vmem:[%s1343_s5 + $0x48] sm:$0xff] (!%p350_p2)   ;;  %v1107_v17 = vld [vmem:[%s1343_s5 + $0x10] sm:$0xff] (!%p350_p2)   ;;  %v1148_v53 = vmov (!%p350_p2), 0.0   ;;  %vm1149_vm1 = vmmov (!%p350_p2), 0   ;;  %vm800_vm2 = vcmask (!%p350_p2), 523264  }
   0xa   : > { %1029 = vmatpush3.bf16.msra.mxu1 (!%p350_p2), %v1103_v12  ;;  %v1105_v15 = vld [vmem:[%s1343_s5 + $0x8] sm:$0xff] (!%p350_p2)   ;;  %v1108_v21 = vld [vmem:[%s1343_s5 + $0x58] sm:$0xff] (!%p350_p2)   ;;  %v1110_v23 = vld [vmem:[%s1343_s5 + $0x60] sm:$0xff] (!%p350_p2)   ;;  %v564_v33 = vsub.s32 (!%p350_p2), 0, %v563_v32  ;;  %v568_v35 = vsub.s32 (!%p350_p2), 1, %v563_v32  ;;  %vm863_vm3 = vcmask (!%p350_p2), 130048  }
   0xb   : > { %454 = vmatpush1.bf16.msra.mxu0 (!%p350_p2), %v1095_v4  ;;  %1030 = vmatprep.subr.bf16.mxu1 (!%p350_p2), %v1104_v14  ;;  %v1109_v22 = vld [vmem:[%s1343_s5 + $0x18] sm:$0xff] (!%p350_p2)   ;;  %v1111_v24 = vld [vmem:[%s1343_s5 + $0x20] sm:$0xff] (!%p350_p2)   ;;  %v1112_v25 = vld [vmem:[%s1343_s5 + $0x68] sm:$0xff] (!%p350_p2)   ;;  %vm908_vm4 = vcmask (!%p350_p2), 64512  }
   0xc   : > { %517 = vmatprep.subr.bf16.mxu0 (!%p350_p2), %v1098_v5  ;;  %v1113_v26 = vld [vmem:[%s1343_s5 + $0x28] sm:$0xff] (!%p350_p2)   ;;  %v1114_v27 = vld [vmem:[%s1343_s5 + $0x70] sm:$0xff] (!%p350_p2)   ;;  %v1116_v29 = vld [vmem:[%s1343_s5 + $0x78] sm:$0xff] (!%p350_p2)  }
   0xd   : > { %s1351_s21 = smov (!%p395_p3, %s984_s21), 5  ;;  %v1115_v28 = vld [vmem:[%s1343_s5 + $0x30] sm:$0xff]   ;;  %v1117_v30 = vld [vmem:[%s1343_s5 + $0x38] sm:$0xff]   ;;  %v560_v34 = vld [vmem:[%s1342_s4] sm:$0x3] }
   0xe   : > { %s1233_s30 = sshll.u32 %s1351_s21, 3  ;;  %1031 = vmatpush3.bf16.msra.mxu1 %v1105_v15  ;;  %v565_v36 = vrot.slane %v560_v34, %v564_v33  ;;  %v569_v37 = vrot.slane %v560_v34, %v568_v35  ;;  %v1118_v52 = vld [vmem:[%s1345_s7] sm:$0xff]   ;;  %v1119_v54 = vld [vmem:[%s1345_s7 + $0x8] sm:$0xff]   ;;  %v1120_v55 = vld [vmem:[%s1345_s7 + $0x10] sm:$0xff]  }
   0xf   : > { %s404_s16 = scalar_lea.vmem %s1339_s1, %s1233_s30  ;;  %s398_s12 = scalar_lea.vmem %s1338_s0, %s1233_s30  ;;  %1032 = vmatprep.subr.bf16.mxu1 %v1106_v16  ;;  %v1121_v56 = vld [vmem:[%s1345_s7 + $0x18] sm:$0xff]   ;;  %v1000_v58 = vld [vmem:[%s1344_s6] ss:$0 sm:$0xff] }
  0x10   : > { %v416_v7 = vld [vmem:[%s404_s16] sm:$0xff]  ;;  %v417_v8 = vld [vmem:[%s404_s16 + $0x8] sm:$0xff]  ;;  %s410_s26 = scalar_lea.vmem %s1349_s11, %s1233_s30 }
  0x11   : > { %v418_v10 = vpack.c.bf16 %v417_v8, %v416_v7  ;;  %v413_v18 = vld [vmem:[%s398_s12] sm:$0xff]  ;;  %v414_v19 = vld [vmem:[%s398_s12 + $0x8] sm:$0xff] }
  0x12   : > { %v415_v20 = vpack.c.bf16 %v414_v19, %v413_v18  ;;  %1033 = vmatpush3.bf16.msra.mxu1 %v1107_v17  ;;  %v1122_v5 = vld [vmem:[%s1347_s9] sm:$0xff]  }
  0x13   : > { %994 = vmatmul.mubr.msk.bf16.vlgmr.msra.gmra.mrb[0].mxu0 %vm447_vm0, %v418_v10  ;;  %1034 = vmatprep.subr.bf16.mxu1 %v1108_v21  ;;  %v1017_v6 = vld [vmem:[%s1346_s8] ss:$0 sm:$0xff] }
  0x14   : > { %518 = vmatpush1.bf16.msra.mxu0 %v1096_v9  ;;  %549 = vmatprep.mubr.bf16.mxu0 %v1147_v2  ;;  %v1023_v16 = vld [vmem:[%s1348_s10] ss:$0 sm:$0xff] }
  0x15   : > { %519 = vmatprep.subr.bf16.mxu0 %v1101_v11 }
  0x16   : > { %1035 = vmatpush3.bf16.msra.mxu1 %v1109_v22 }
  0x17   : > { %1036 = vmatprep.subr.bf16.mxu1 %v1110_v23 }
  0x18   : > { %520 = vmatpush1.bf16.msra.mxu0 %v1099_v13 }
  0x19   : > { %1057 = vmatprep.subr.bf16.mxu0 %v1148_v53 }
  0x1a   : > { %1037 = vmatpush3.bf16.msra.mxu1 %v1111_v24 }
  0x1b   : > { %1038 = vmatprep.subr.bf16.mxu1 %v1112_v25 }
  0x1e   : > { %1039 = vmatpush3.bf16.msra.mxu1 %v1113_v26 }
  0x1f   : > { %999 = vmatmul.mubr.msk.bf16.vlgmr.msra.gmra.mrb[0].mxu0 %vm447_vm0, %v415_v20  ;;  %1040 = vmatprep.subr.bf16.mxu1 %v1114_v27 }
  0x20   : > { %1058 = vmatpush3.bf16.msra.mxu0 %v1118_v52  ;;  %1065 = vmatprep.mubr.msk.bf16.mxu0 %vm1149_vm1, %v1148_v53 }
  0x21   : > { %1059 = vmatprep.subr.bf16.mxu0 %v1148_v53 }
  0x22   : > { %1041 = vmatpush3.bf16.msra.mxu1 %v1115_v28 }
  0x23   : > { %1042 = vmatprep.subr.bf16.mxu1 %v1116_v29 }
  0x24   : > { %1060 = vmatpush3.bf16.msra.mxu0 %v1119_v54 }
  0x25   : > { %1061 = vmatprep.subr.bf16.mxu0 %v1148_v53 }
  0x26   : > { %1043 = vmatpush3.bf16.msra.mxu1 %v1117_v30 }
  0x28   : > { %1062 = vmatpush3.bf16.msra.mxu0 %v1120_v55 }
  0x29   : > { %1063 = vmatprep.subr.bf16.mxu0 %v1148_v53 }
  0x2c   : > { %1064 = vmatpush3.bf16.msra.mxu0 %v1121_v56 }
  0x2d   : > { %1069 = vmatprep.subr.bf16.mxu0 %v1148_v53 }
  0xf2   : > { %v551_v38 = vpop.f32.mrb[0].mxu0 }
  0xf3   : > { %v572_v39 = vadd.f32 %v565_v36, %v551_v38  ;;  %v553_v40 = vpop.f32.mrb[1].mxu0 }
  0xf4   : > { %v573_v41 = vadd.f32 %v569_v37, %v553_v40  ;;  %v555_v42 = vpop.f32.mrb[2].mxu0 }
  0xf5   : > { %1123 = vtanh.f32 %v572_v39  ;;  %v574_v43 = vadd.f32 %v565_v36, %v555_v42  ;;  %v557_v44 = vpop.f32.mrb[3].mxu0 }
  0xf6   : > { %1125 = vtanh.f32 %v573_v41  ;;  %v575_v45 = vadd.f32 %v569_v37, %v557_v44 }
  0xf7   : > { %1127 = vtanh.f32 %v574_v43 }
  0xf8   : > { %1129 = vtanh.f32 %v575_v45 }
  0xff   : > { %v1124_v46 = vpop.eup %1123 }
 0x100   : > { %v1126_v47 = vpop.eup %1125 }
 0x101   : > { %v1128_v48 = vpop.eup %1127 }
 0x102   : > { %v1130_v49 = vpop.eup %1129  ;;  %v580_v50 = vpack.c.bf16 %v1128_v48, %v1124_v46 }
 0x103   : > { %v581_v51 = vpack.c.bf16 %v1130_v49, %v1126_v47 }
 0x105   : > { %749 = vmatprep.mubr.bf16.mxu1 %v581_v51 }
 0x106   : > { %750 = vmatmul.mubr.bf16.vlgmr.msra.gmra.mrb[0].mxu1 %v580_v50 }
 0x1d9   : > { %v1044_v57 = vpop.f32.mrb[0].mxu1 }
 0x1da   : > { %v1045_v59 = vpop.f32.mrb[1].mxu1 }
 0x1db   : > { %v1046_v60 = vadd.f32 %v1045_v59, %v1044_v57  ;;  %v1047_v61 = vpop.f32.mrb[2].mxu1 }
 0x1dc   : > { %v1048_v62 = vpop.f32.mrb[3].mxu1 }
 0x1dd   : > { %v752_v63 = vadd.f32 %v1046_v60, %v1000_v58  ;;  %v1049_v0 = vadd.f32 %v1048_v62, %v1047_v61 }
 0x1df   : > { %v755_v1 = vadd.f32 %v1049_v0, %v1000_v58  ;;  %1131 = vtanh.f32 %v752_v63 }
 0x1e1   : > { %1133 = vtanh.f32 %v755_v1 }
 0x1e9   : > { %v1132_v2 = vpop.eup %1131 }
 0x1eb   : > { %v1134_v3 = vpop.eup %1133 }
 0x1ec   : > { %v760_v4 = vpack.c.bf16 %v1134_v3, %v1132_v2 }
 0x1ee   : > { %1066 = vmatmul.mubr.msk.bf16.vlgmr.msra.gmra.mrb[4].mxu0 %vm800_vm2, %v760_v4 }
 0x1ef   : > { %1071 = vmatprep.mubr.msk.bf16.mxu0 %vm1149_vm1, %v1148_v53  ;;  %1070 = vmatpush3.bf16.msra.mxu0 %v1122_v5 }
 0x2c1   : > { %v838_v7 = vpop.f32.mrb[4].mxu0 }
 0x2c2   : > { %v839_v8 = vadd.f32 %v1017_v6, %v838_v7  ;;  %v1067_v9 = vpop.f32.mrb[5].mxu0 }
 0x2c3   : > { %v841_v10 = vpop.f32.mrb[6].mxu0 }
 0x2c4   : > { %v842_v11 = vadd.f32 %v1017_v6, %v841_v10  ;;  %v1068_v12 = vpop.f32.mrb[7].mxu0  ;;  %1135 = vtanh.f32 %v839_v8 }
 0x2c6   : > { %1137 = vtanh.f32 %v842_v11 }
 0x2ce   : > { %v1136_v13 = vpop.eup %1135 }
 0x2d0   : > { %v1138_v14 = vpop.eup %1137 }
 0x2d1   : > { %v847_v15 = vpack.c.bf16 %v1138_v14, %v1136_v13 }
 0x2d3   : > { %1072 = vmatmul.mubr.msk.bf16.vlgmr.msra.gmra.mrb[8].mxu0 %vm863_vm3, %v847_v15 }
 0x3a6   : > { %v901_v17 = vpop.f32.mrb[8].mxu0 }
 0x3a7   : > { %v902_v18 = vadd.f32 %v1023_v16, %v901_v17  ;;  %v1073_v19 = vpop.f32.mrb[9].mxu0 }
 0x3a8   : > { %v904_v20 = vpop.f32.mrb[10].mxu0 }
 0x3a9   : > { %909 = vst.msk [vmem:[%s410_s26] sm:$0xff] %vm908_vm4, %v902_v18  ;;  %v905_v21 = vadd.f32 %v1023_v16, %v904_v20  ;;  %v1074_v22 = vpop.f32.mrb[11].mxu0 }
 0x3ab   : > { %910 = vst.msk [vmem:[%s410_s26 + $0x8] sm:$0xff] %vm908_vm4, %v905_v21 }
 0x3ac PF: > { %s21_s17 = sadd.s32 1, %s1145_s17  }
 0x3ad   : > { %p18_p4 = scmp.ge.s32.totalorder %s21_s17, 5  }
 0x3af   :  { %20 = sbr.rel (!%p18_p4) target bundleno = 1 (0x1), region = 97 }

</bundles_post_ra>
